<compile_context>
chip_gen: v6e
topology: v6e:2x2x1
jax: 0.10.0
libtpu: 0.0.40
codegen_flags: <defaults>
</compile_context>

<pallas_src>
import jax
import jax.numpy as jnp
from jax import lax
from jax.experimental import pallas as pl
from jax.experimental.pallas import tpu as pltpu

_LANES = 128


def _round_up(x, m):
    return ((x + m - 1) // m) * m


def _device_defaults():
    """Return (num_parallel_blocks, default_tile_rows) for this TPU generation."""
    try:
        kind = jax.devices()[0].device_kind.lower()
    except Exception:
        kind = ""
    if "v7" in kind or "tpu7" in kind:
        # v7x: 2 TensorCores share ~3.2 TB/s HBM -> shard the row axis across
        # both cores and use larger tiles to amortize per-grid-step overhead.
        return 2, 4096
    return 1, 2048


def _make_loss_kernel(tile_rows, chunk_rows, lanes=_LANES):
    """Kernel with static tile / chunk sizes baked in."""
    n_chunks = tile_rows // chunk_rows
    sub_blocks = chunk_rows // 8
    if n_chunks <= 8:
        unroll = True
    elif n_chunks % 4 == 0:
        unroll = 4
    else:
        unroll = False

    def kernel(pred_ref, targ_ref, out_ref):
        # grid = (parallel_blocks, inner_row_tiles); out block constant over
        # the inner axis -> the (3,8,128) output block is the accumulator.
        i = pl.program_id(1)

        @pl.when(i == 0)
        def _():
            out_ref[...] = jnp.zeros_like(out_ref)

        def chunk_body(j, carry):
            a_sq, a_rel, a_l1 = carry
            r0 = pl.multiple_of(j * chunk_rows, chunk_rows)
            # Cast in-kernel (inputs may be bf16 upstream; HBM traffic stays narrow).
            p = pred_ref[pl.ds(r0, chunk_rows), :].astype(jnp.float32)
            t = targ_ref[pl.ds(r0, chunk_rows), :].astype(jnp.float32)
            d = p - t
            ad = jnp.abs(d)
            # EUP approx reciprocal: frees VALU slots; error is buried under
            # the 0.01 weight on the rel term.
            rel = ad * pl.reciprocal(t + jnp.float32(1e-6), approx=True)
            sq = d * d
            if sub_blocks > 1:
                # (chunk,128)->(chunk//8,8,128); leading-axis sum is plain
                # vreg-wise VPU adds, no XLU work, no full-tile temporaries.
                sq = sq.reshape(sub_blocks, 8, lanes).sum(axis=0)
                rel = rel.reshape(sub_blocks, 8, lanes).sum(axis=0)
                ad = ad.reshape(sub_blocks, 8, lanes).sum(axis=0)
            return a_sq + sq, a_rel + rel, a_l1 + ad

        zeros = jnp.zeros((8, lanes), jnp.float32)
        a_sq, a_rel, a_l1 = lax.fori_loop(
            0, n_chunks, chunk_body, (zeros, zeros, zeros), unroll=unroll)

        out_ref[0, :, :] += a_sq    # -> mse numerator
        out_ref[1, :, :] += a_rel   # -> rel_error numerator
        out_ref[2, :, :] += a_l1    # -> l1 numerator

    return kernel


def custom_loss(pred, target, *, tile_rows=None, num_parallel_blocks=None):
    """JAX/Pallas equivalent of CustomLoss.forward(pred, target)."""
    assert pred.shape == target.shape
    n = pred.size
    assert n > 0

    auto_blocks, auto_tile = _device_defaults()
    n_par = int(num_parallel_blocks) if num_parallel_blocks is not None else auto_blocks
    tile_req = int(tile_rows) if tile_rows is not None else auto_tile

    itemsize = pred.dtype.itemsize
    # Sub-32-bit dtypes pack rows along sublanes -> stronger row alignment.
    align = {4: 8, 2: 16, 1: 32}.get(itemsize, 8)

    rows = pl.cdiv(n, _LANES)
    tile = min(max(tile_req, align), _round_up(rows, align))
    tile = _round_up(tile, align)

    inner = pl.cdiv(rows, n_par * tile)
    rows_padded = n_par * inner * tile

    pf = pred.reshape(-1)
    tf = target.reshape(-1)
    pad = rows_padded * _LANES - n
    if pad > 0:
        # Pad BOTH with the same value (1.0): diff == 0 and the rel denominator
        # is ~1, so padding contributes exactly 0 to every sum -> no mask.
        pf = jnp.pad(pf, (0, pad), constant_values=1.0)
        tf = jnp.pad(tf, (0, pad), constant_values=1.0)
    pf = pf.reshape(rows_padded, _LANES)
    tf = tf.reshape(rows_padded, _LANES)

    # Chunk size for the in-kernel accumulation loop (must divide tile).
    if tile % 64 == 0:
        chunk = 64
    elif tile <= 64:
        chunk = tile
    else:
        chunk = align

    cost = pl.CostEstimate(
        flops=8 * n,
        transcendentals=n,                                   # the reciprocal
        bytes_accessed=2 * n * itemsize + n_par * 3 * 8 * _LANES * 4,
    )

    partials = pl.pallas_call(
        _make_loss_kernel(tile, chunk),
        out_shape=jax.ShapeDtypeStruct((n_par, 3, 8, _LANES), jnp.float32),
        grid=(n_par, inner),
        in_specs=[
            pl.BlockSpec((tile, _LANES), lambda c, i: (c * inner + i, 0)),
            pl.BlockSpec((tile, _LANES), lambda c, i: (c * inner + i, 0)),
        ],
        out_specs=pl.BlockSpec((None, 3, 8, _LANES), lambda c, i: (c, 0, 0, 0)),
        compiler_params=pltpu.CompilerParams(
            dimension_semantics=("parallel", "arbitrary"),
            vmem_limit_bytes=32 * 1024 * 1024,
        ),
        cost_estimate=cost,
    )(pf, tf)

    # Tiny final collapse (per-core (3,8,128) partials) done by XLA.
    sums = jnp.sum(partials, axis=(0, 2, 3))
    nf = jnp.float32(n)
    mse = sums[0] / nf
    rel_error = sums[1] / nf
    l1_loss = sums[2] / nf
    return mse + 0.01 * rel_error + 0.05 * l1_loss


def _reference_loss(pred, target):
    p = pred.astype(jnp.float32)
    t = target.astype(jnp.float32)
    mse = jnp.mean((p - t) ** 2)
    rel = jnp.mean(jnp.abs(p - t) / (t + 1e-6))
    l1 = jnp.mean(jnp.abs(p - t))
    return mse + 0.01 * rel + 0.05 * l1


if __name__ == "__main__":
    key = jax.random.PRNGKey(0)
    kp, kt = jax.random.split(key)
    # shapes consistent with a regression output (NCHW-style tensor)
    pred = jax.random.normal(kp, (2, 4, 16, 16), dtype=jnp.float32)
    # keep target positive like a physical measurement (avoids the 1e-6
    # denominator dominating the comparison)
    target = jax.random.uniform(kt, (2, 4, 16, 16), dtype=jnp.float32,
                                minval=0.5, maxval=2.0)

    loss = jax.block_until_ready(custom_loss(pred, target))
    ref = jax.block_until_ready(_reference_loss(pred, target))

    # 1e-4 tolerance comfortably covers the EUP approx-reciprocal error on the
    # 0.01-weighted rel term.
    assert jnp.allclose(loss, ref, rtol=1e-4, atol=1e-4), (loss, ref)

    print("KERNEL_OK")
</pallas_src>

<mosaic_0001>
module attributes {stable_mosaic.version = 11 : i64} {
  func.func @kernel(%arg0: i32, %arg1: i32, %arg2: memref<16x128xf32, #tpu.memory_space<vmem>>, %arg3: memref<16x128xf32, #tpu.memory_space<vmem>>, %arg4: memref<1x3x8x128xf32, #tpu.memory_space<vmem>>) attributes {dimension_semantics = [#tpu.dimension_semantics<parallel>, #tpu.dimension_semantics<arbitrary>], iteration_bounds = array<i64: 1, 1>, scalar_prefetch = 0 : i64, scratch_operands = 0 : i64, tpu.core_type = #tpu.core_type<tc>, window_params = [{transform_indices = @transform_0, window_bounds = array<i64: 16, 128>}, {transform_indices = @transform_1, window_bounds = array<i64: 16, 128>}, {transform_indices = @transform_2, window_bounds = array<i64: 1, 3, 8, 128>}]} {
    %c0_i32 = arith.constant 0 : i32
    %0 = arith.cmpi eq, %arg1, %c0_i32 : i32
    %1 = arith.extui %0 : i1 to i32
    %c0_i32_0 = arith.constant 0 : i32
    %2 = arith.cmpi ne, %1, %c0_i32_0 : i32
    scf.if %2 {
      %cst_29 = arith.constant 0.000000e+00 : f32
      %44 = vector.broadcast %cst_29 : f32 to vector<3x8x128xf32>
      %c0_30 = arith.constant 0 : index
      %c0_31 = arith.constant 0 : index
      %c0_32 = arith.constant 0 : index
      %c0_33 = arith.constant 0 : index
      %45 = vector.load %arg4[%c0_30, %c0_31, %c0_32, %c0_33] : memref<1x3x8x128xf32, #tpu.memory_space<vmem>>, vector<1x3x8x128xf32>
      %46 = vector.shape_cast %45 : vector<1x3x8x128xf32> to vector<3x8x128xf32>
      %47 = vector.shape_cast %44 : vector<3x8x128xf32> to vector<1x3x8x128xf32>
      tpu.vector_store %arg4[%c0_30, %c0_31, %c0_32, %c0_33], %47 {strides = array<i32>} : memref<1x3x8x128xf32, #tpu.memory_space<vmem>>, vector<1x3x8x128xf32>,
    } else {
    }
    %cst = arith.constant 0.000000e+00 : f32
    %3 = vector.broadcast %cst : f32 to vector<8x128xf32>
    %c0_i32_1 = arith.constant 0 : i32
    %c16_i32 = arith.constant 16 : i32
    %4 = arith.muli %c0_i32_1, %c16_i32 : i32
    %5 = tpu.assume_multiple %4, 16 : i32
    %6 = arith.index_cast %5 : i32 to index
    %c0 = arith.constant 0 : index
    %7 = vector.load %arg2[%6, %c0] : memref<16x128xf32, #tpu.memory_space<vmem>>, vector<16x128xf32>
    %8 = arith.index_cast %5 : i32 to index
    %c0_2 = arith.constant 0 : index
    %9 = vector.load %arg3[%8, %c0_2] : memref<16x128xf32, #tpu.memory_space<vmem>>, vector<16x128xf32>
    %10 = arith.subf %7, %9 : vector<16x128xf32>
    %11 = math.absf %10 : vector<16x128xf32>
    %cst_3 = arith.constant 9.99999997E-7 : f32
    %12 = vector.broadcast %cst_3 : f32 to vector<16x128xf32>
    %13 = arith.addf %9, %12 : vector<16x128xf32>
    %14 = tpu.reciprocal %13 {approx = true} : vector<16x128xf32> -> vector<16x128xf32>
    %15 = arith.mulf %11, %14 : vector<16x128xf32>
    %16 = arith.mulf %10, %10 : vector<16x128xf32>
    %17 = vector.shape_cast %16 : vector<16x128xf32> to vector<2x8x128xf32>
    %cst_4 = arith.constant dense<0.000000e+00> : vector<8x128xf32>
    %18 = vector.multi_reduction <add>, %17, %cst_4 [0] : vector<2x8x128xf32> to vector<8x128xf32>
    %19 = vector.shape_cast %15 : vector<16x128xf32> to vector<2x8x128xf32>
    %cst_5 = arith.constant dense<0.000000e+00> : vector<8x128xf32>
    %20 = vector.multi_reduction <add>, %19, %cst_5 [0] : vector<2x8x128xf32> to vector<8x128xf32>
    %21 = vector.shape_cast %11 : vector<16x128xf32> to vector<2x8x128xf32>
    %cst_6 = arith.constant dense<0.000000e+00> : vector<8x128xf32>
    %22 = vector.multi_reduction <add>, %21, %cst_6 [0] : vector<2x8x128xf32> to vector<8x128xf32>
    %23 = arith.addf %3, %18 : vector<8x128xf32>
    %24 = arith.addf %3, %20 : vector<8x128xf32>
    %25 = arith.addf %3, %22 : vector<8x128xf32>
    %c1_i32 = arith.constant 1 : i32
    %c0_7 = arith.constant 0 : index
    %c0_8 = arith.constant 0 : index
    %c0_9 = arith.constant 0 : index
    %c0_10 = arith.constant 0 : index
    %26 = vector.load %arg4[%c0_7, %c0_8, %c0_9, %c0_10] : memref<1x3x8x128xf32, #tpu.memory_space<vmem>>, vector<1x1x8x128xf32>
    %27 = vector.shape_cast %26 : vector<1x1x8x128xf32> to vector<8x128xf32>
    %28 = arith.addf %27, %23 : vector<8x128xf32>
    %c0_11 = arith.constant 0 : index
    %c0_12 = arith.constant 0 : index
    %c0_13 = arith.constant 0 : index
    %c0_14 = arith.constant 0 : index
    %29 = vector.load %arg4[%c0_11, %c0_12, %c0_13, %c0_14] : memref<1x3x8x128xf32, #tpu.memory_space<vmem>>, vector<1x1x8x128xf32>
    %30 = vector.shape_cast %29 : vector<1x1x8x128xf32> to vector<8x128xf32>
    %31 = vector.shape_cast %28 : vector<8x128xf32> to vector<1x1x8x128xf32>
    tpu.vector_store %arg4[%c0_11, %c0_12, %c0_13, %c0_14], %31 {strides = array<i32>} : memref<1x3x8x128xf32, #tpu.memory_space<vmem>>, vector<1x1x8x128xf32>,
    %c0_15 = arith.constant 0 : index
    %c1 = arith.constant 1 : index
    %c0_16 = arith.constant 0 : index
    %c0_17 = arith.constant 0 : index
    %32 = vector.load %arg4[%c0_15, %c1, %c0_16, %c0_17] : memref<1x3x8x128xf32, #tpu.memory_space<vmem>>, vector<1x1x8x128xf32>
    %33 = vector.shape_cast %32 : vector<1x1x8x128xf32> to vector<8x128xf32>
    %34 = arith.addf %33, %24 : vector<8x128xf32>
    %c0_18 = arith.constant 0 : index
    %c1_19 = arith.constant 1 : index
    %c0_20 = arith.constant 0 : index
    %c0_21 = arith.constant 0 : index
    %35 = vector.load %arg4[%c0_18, %c1_19, %c0_20, %c0_21] : memref<1x3x8x128xf32, #tpu.memory_space<vmem>>, vector<1x1x8x128xf32>
    %36 = vector.shape_cast %35 : vector<1x1x8x128xf32> to vector<8x128xf32>
    %37 = vector.shape_cast %34 : vector<8x128xf32> to vector<1x1x8x128xf32>
    tpu.vector_store %arg4[%c0_18, %c1_19, %c0_20, %c0_21], %37 {strides = array<i32>} : memref<1x3x8x128xf32, #tpu.memory_space<vmem>>, vector<1x1x8x128xf32>,
    %c0_22 = arith.constant 0 : index
    %c2 = arith.constant 2 : index
    %c0_23 = arith.constant 0 : index
    %c0_24 = arith.constant 0 : index
    %38 = vector.load %arg4[%c0_22, %c2, %c0_23, %c0_24] : memref<1x3x8x128xf32, #tpu.memory_space<vmem>>, vector<1x1x8x128xf32>
    %39 = vector.shape_cast %38 : vector<1x1x8x128xf32> to vector<8x128xf32>
    %40 = arith.addf %39, %25 : vector<8x128xf32>
    %c0_25 = arith.constant 0 : index
    %c2_26 = arith.constant 2 : index
    %c0_27 = arith.constant 0 : index
    %c0_28 = arith.constant 0 : index
    %41 = vector.load %arg4[%c0_25, %c2_26, %c0_27, %c0_28] : memref<1x3x8x128xf32, #tpu.memory_space<vmem>>, vector<1x1x8x128xf32>
    %42 = vector.shape_cast %41 : vector<1x1x8x128xf32> to vector<8x128xf32>
    %43 = vector.shape_cast %40 : vector<8x128xf32> to vector<1x1x8x128xf32>
    tpu.vector_store %arg4[%c0_25, %c2_26, %c0_27, %c0_28], %43 {strides = array<i32>} : memref<1x3x8x128xf32, #tpu.memory_space<vmem>>, vector<1x1x8x128xf32>,
    return
  }
  func.func @transform_0(%arg0: i32, %arg1: i32) -> (i32, i32) {
    %c1_i32 = arith.constant 1 : i32
    %0 = arith.muli %arg0, %c1_i32 : i32
    %1 = arith.addi %0, %arg1 : i32
    %c0_i32 = arith.constant 0 : i32
    %c0_i32_0 = arith.constant 0 : i32
    return %1, %c0_i32 : i32, i32
  }
  func.func @transform_1(%arg0: i32, %arg1: i32) -> (i32, i32) {
    %c1_i32 = arith.constant 1 : i32
    %0 = arith.muli %arg0, %c1_i32 : i32
    %1 = arith.addi %0, %arg1 : i32
    %c0_i32 = arith.constant 0 : i32
    %c0_i32_0 = arith.constant 0 : i32
    return %1, %c0_i32 : i32, i32
  }
  func.func @transform_2(%arg0: i32, %arg1: i32) -> (i32, i32, i32, i32) {
    %c0_i32 = arith.constant 0 : i32
    %c0_i32_0 = arith.constant 0 : i32
    %c0_i32_1 = arith.constant 0 : i32
    %c0_i32_2 = arith.constant 0 : i32
    return %arg0, %c0_i32, %c0_i32_0, %c0_i32_1 : i32, i32, i32, i32
  }
}

</mosaic_0001>

<bundles_post_ra>
// kernel: tpu_custom_call.1
= control target key start
LH: loop header
LB: loop body
LE: loop exit
PB: predicated region body
PF: predicated region fallthrough
CT: control target
= control target key end

     0   :  { %7 = vsyncpa [#allocation3], 0  ;;  %s224_s0 = inlined_call_operand.hbm [shape: f32[16,128], index: 0, kind: input, shape index: {}]   ;;  %s225_s1 = inlined_call_operand.hbm [shape: f32[16,128], index: 1, kind: input, shape index: {}]   ;;  %s226_s2 = inlined_call_operand.hbm [shape: f32[1,3,8,128], index: 2, kind: output, shape index: {}]  }
   0x1   :  { %8 = vsyncpa [#allocation6], 0 }
   0x2   :  { %9 = vsyncpa [#allocation4], 0  ;;  %s186_s9 = smov [#allocation2]  }
   0x3   :  { %s19_s10 = sshll.u32 %s186_s9, 4  ;;  %s20_s10 = int_to_ptr.vmem [resolvable:$true] %s19_s10 }
   0x4   :  { %s128_s11 = scalar_lea.vmem %s20_s10, 256  ;;  %p133_p1 = scmp.lt.s32.totalorder %s20_s10, %s20_s10 }
   0x5   :  { %p129_p0 = scmp.ne.s32.totalorder %s20_s10, %s128_s11  ;;  %p134_p2 = scmp.lt.s32.totalorder %s128_s11, %s128_s11 }
   0x7   :  { %p135_p3 = por %p134_p2, %p133_p1 }
   0x9   :  { %p136_p4 = pnand %p135_p3, %p129_p0 }
   0xb   :  { %139 = shalt.err (!%p136_p4)
}
   0xc   :  { %s187_s12 = smov 128   ;;  %s188_s13 = smov 8  }
   0xd   :  { %25 = dma.hbm_to_vmem [thread:$0]  %s224_s0, 256, %s20_s10, [#allocation3], %s187_s12, %s187_s12, %s188_s13  }
   0xe   :  { %s189_s16 = smov [#allocation5]  }
   0xf   :  { %s35_s17 = sshll.u32 %s189_s16, 4  ;;  %s36_s17 = int_to_ptr.vmem [resolvable:$true] %s35_s17 }
  0x10   :  { %s148_s18 = scalar_lea.vmem %s36_s17, 256  ;;  %p153_p6 = scmp.lt.s32.totalorder %s36_s17, %s36_s17 }
  0x11   :  { %p149_p5 = scmp.ne.s32.totalorder %s36_s17, %s148_s18  ;;  %p154_p7 = scmp.lt.s32.totalorder %s148_s18, %s148_s18 }
  0x13   :  { %p155_p8 = por %p154_p7, %p153_p6 }
  0x15   :  { %p156_p9 = pnand %p155_p8, %p149_p5 }
  0x17   :  { %159 = shalt.err (!%p156_p9)
}
  0x18   :  { %41 = dma.hbm_to_vmem [thread:$0]  %s225_s1, 256, %s36_s17, [#allocation6], %s187_s12, %s187_s12, %s188_s13  }
  0x19   :  { %180 = dma.done.wait [#allocation3], 256  }
  0x1a   :  { %181 = vsyncadd [#allocation3], 4294967040 }
  0x1b   :  { %182 = dma.done.wait [#allocation6], 256  }
  0x1c   :  { %183 = vsyncadd [#allocation6], 4294967040  ;;  %v59_v0 = vld [vmem:[#allocation2] sm:$0xff]  ;;  %v60_v1 = vld [vmem:[#allocation2 + $0x8] sm:$0xff]  ;;  %s190_s0 = smov [#allocation7]  }
  0x1d   :  { %v61_v2 = vld [vmem:[#allocation5] sm:$0xff]  ;;  %v62_v3 = vld [vmem:[#allocation5 + $0x8] sm:$0xff]  ;;  %s97_s1 = sshll.u32 %s190_s0, 4  ;;  %s98_s1 = int_to_ptr.vmem [resolvable:$true] %s97_s1 }
  0x1e   :  { %v63_v4 = vsub.f32 %v59_v0, %v61_v2  ;;  %v67_v5 = vadd.f32 1e-06, %v61_v2  ;;  %v64_v6 = vsub.f32 %v60_v1, %v62_v3  ;;  %v68_v7 = vadd.f32 1e-06, %v62_v3  ;;  %s160_s21 = scalar_lea.vmem %s98_s1, 384  ;;  %p165_p11 = scmp.lt.s32.totalorder %s98_s1, %s98_s1 }
  0x1f   :  { %p161_p10 = scmp.ne.s32.totalorder %s98_s1, %s160_s21  ;;  %p166_p12 = scmp.lt.s32.totalorder %s160_s21, %s160_s21 }
  0x20   :  { %116 = vrcp.f32 %v67_v5  ;;  %v73_v8 = vmul.f32 %v63_v4, %v63_v4  ;;  %v74_v9 = vmul.f32 %v64_v6, %v64_v6  ;;  %v65_v10 = vand.u32 2147483647, %v63_v4 }
  0x21   :  { %118 = vrcp.f32 %v68_v7  ;;  %v66_v11 = vand.u32 2147483647, %v64_v6  ;;  %p167_p13 = por %p166_p12, %p165_p11 }
  0x22   :  { %v75_v12 = vadd.f32 %v74_v9, %v73_v8 }
  0x23   :  { %v77_v13 = vadd.f32 %v66_v11, %v65_v10  ;;  %p168_p0 = pnand %p167_p13, %p161_p10 }
  0x24   :  { %83 = vst [vmem:[#allocation7] sm:$0xff] %v75_v12 }
  0x25   :  { %91 = vst [vmem:[#allocation7 + $0x10] sm:$0xff] %v77_v13 }
  0x2d   :  { %v117_v14 = vpop.eup %116 }
  0x2e   :  { %v119_v15 = vpop.eup %118  ;;  %v71_v16 = vmul.f32 %v117_v14, %v65_v10 }
  0x2f   :  { %v72_v17 = vmul.f32 %v119_v15, %v66_v11 }
  0x31   :  { %v76_v18 = vadd.f32 %v72_v17, %v71_v16 }
  0x33   :  { %87 = vst [vmem:[#allocation7 + $0x8] sm:$0xff] %v76_v18 }
  0x34   :  { %171 = shalt.err (!%p168_p0)
}
  0x35   :  { %103 = dma.vmem_to_hbm [thread:$0]  %s98_s1, 384, %s226_s2, [#allocation4], %s187_s12, %s187_s12, %s188_s13  }
  0x36   :  { %184 = dma.done.wait [#allocation4], 384  }
  0x37   :  { %185 = vsyncadd [#allocation4], 4294966912 }
  0x38   :  { %107 = vsyncpa [#allocation3], 1 }
  0x39   :  { %108 = vsyncpa [#allocation6], 1 }
  0x3a   :  { %109 = vsyncpa [#allocation4], 1 }

</bundles_post_ra>
